<compile_context>
chip_gen: v6e
topology: v6e:2x2x1
jax: 0.10.0
libtpu: 0.0.40
codegen_flags: <defaults>
</compile_context>

<pallas_src>
import functools
import math

import jax
import jax.numpy as jnp
from jax.experimental import pallas as pl
from jax.experimental.pallas import tpu as pltpu

D_MODEL = 32
MAX_LEN = 64
DROPOUT_P = 0.1


def make_pe_table(d_model: int, max_len: int) -> jnp.ndarray:
    """Deterministic sinusoidal table, same formula as the torch __init__."""
    position = jnp.arange(max_len, dtype=jnp.float32)[:, None]            # [L, 1]
    div_term = jnp.exp(
        jnp.arange(0, d_model, 2, dtype=jnp.float32) * (-math.log(10000.0) / d_model)
    )                                                                      # [D/2]
    angles = position * div_term                                           # [L, D/2]
    pe = jnp.zeros((max_len, d_model), dtype=jnp.float32)
    pe = pe.at[:, 0::2].set(jnp.sin(angles))
    pe = pe.at[:, 1::2].set(jnp.cos(angles))
    return pe                                                              # [L, D]


# ----------------------------- kernels ------------------------------------


def _add_kernel(x_ref, pe_ref, o_ref):
    # x_ref : (tile_rows, lanes)   lane-dense input tile
    # pe_ref: (1, lanes)           pre-scaled PE row, broadcast over rows
    o_ref[...] = (x_ref[...] + pe_ref[...]).astype(o_ref.dtype)


def _add_dropout_kernel(x_ref, pe_ref, bits_ref, o_ref, *, threshold: int, scale: float):
    y = x_ref[...] + pe_ref[...]
    # Integer threshold compare: P(drop) = threshold / 2^32  ~= p  (unbiased).
    keep = bits_ref[...] >= jnp.uint32(threshold)
    o_ref[...] = jnp.where(keep, y * scale, 0.0).astype(o_ref.dtype)


# ----------------------------- wrapper -------------------------------------


def _pick_tile_rows(n_rows: int, lanes: int, target_bytes: int = 2 << 20) -> int:
    """Largest seq tile that keeps a block ~<= 2 MiB (multiple of 8 rows)."""
    rows = max(1, target_bytes // (4 * lanes))
    if rows >= n_rows:
        return n_rows                      # single block, no per-step overhead
    return max(8, (rows // 8) * 8)


def positional_encoding(x, pe_table, dropout_key=None, *, p: float = DROPOUT_P,
                        train: bool = True, use_pallas_in_eval: bool = True):
    S, B, D = x.shape
    assert B <= pe_table.shape[0] and D == pe_table.shape[1]
    assert 0.0 <= p < 1.0

    # Matches: x + self.pe[:, :x.size(1)] / math.sqrt(self.d_model)
    pe_scaled = (pe_table[:B, :] / math.sqrt(D)).astype(jnp.float32)       # [B, D]

    apply_dropout = train and p > 0.0

    if not apply_dropout and not use_pallas_in_eval:
        # Without dropout this is a single broadcast add; XLA fuses it for free,
        # so skip the kernel launch entirely (review recommendation).
        return (x + pe_scaled[None, :, :]).astype(x.dtype)

    # Lane-dense layout: fold (B, D) into one 128-lane (in the demo) last dim.
    lanes = B * D
    x2 = x.reshape(S, lanes)
    pe_flat = pe_scaled.reshape(1, lanes)

    tile_rows = _pick_tile_rows(S, lanes)
    grid = (pl.cdiv(S, tile_rows),)

    row_spec = pl.BlockSpec((tile_rows, lanes), lambda i: (i, 0))
    pe_spec = pl.BlockSpec((1, lanes), lambda i: (0, 0))

    if apply_dropout:
        assert dropout_key is not None, "train-mode dropout needs a PRNG key"
        bits = jax.random.bits(dropout_key, (S, lanes), dtype=jnp.uint32)
        threshold = min(int(round(p * (1 << 32))), (1 << 32) - 1)
        kernel = functools.partial(_add_dropout_kernel,
                                   threshold=threshold, scale=1.0 / (1.0 - p))
        in_specs = [row_spec, pe_spec, row_spec]
        args = (x2, pe_flat, bits)
    else:
        kernel = _add_kernel
        in_specs = [row_spec, pe_spec]
        args = (x2, pe_flat)

    out2 = pl.pallas_call(
        kernel,
        out_shape=jax.ShapeDtypeStruct((S, lanes), x.dtype),
        grid=grid,
        in_specs=in_specs,
        out_specs=row_spec,
        compiler_params=pltpu.CompilerParams(
            dimension_semantics=("parallel",)),   # lets v7x megacore shard seq
    )(*args)
    return out2.reshape(S, B, D)


# ----------------------------- demo / checks -------------------------------


if __name__ == "__main__":
    root = jax.random.PRNGKey(0)
    data_key, drop_key = jax.random.split(root)

    S, B, D = 8, 4, D_MODEL                    # seq_len, batch, embedding_dim
    x = jax.random.normal(data_key, (S, B, D), dtype=jnp.float32)
    pe_table = make_pe_table(D_MODEL, MAX_LEN)

    # Pure-JAX reference of the (quirky) torch forward, eval mode.
    ref = x + (pe_table[:B, :] / math.sqrt(D_MODEL))[None, :, :]

    # 1) Eval mode through the Pallas kernel (dropout compiled out): bit-comparable.
    out_eval = jax.block_until_ready(
        positional_encoding(x, pe_table, train=False, use_pallas_in_eval=True))
    assert out_eval.shape == (S, B, D)
    assert jnp.allclose(out_eval, ref, atol=1e-6, rtol=1e-6)

    # 2) Eval mode via the plain-XLA fast path.
    out_eval_xla = jax.block_until_ready(
        positional_encoding(x, pe_table, train=False, use_pallas_in_eval=False))
    assert jnp.allclose(out_eval_xla, ref, atol=1e-6, rtol=1e-6)

    # 3) Train mode: fused dropout.  Every output element must be either 0 or
    #    the reference value scaled by 1/(1-p).
    out_train = jax.block_until_ready(
        positional_encoding(x, pe_table, drop_key, train=True))
    assert out_train.shape == (S, B, D)
    scaled = ref / (1.0 - DROPOUT_P)
    ok = jnp.isclose(out_train, 0.0) | jnp.isclose(out_train, scaled,
                                                   atol=1e-5, rtol=1e-5)
    assert bool(jnp.all(ok))

    print("KERNEL_OK")
</pallas_src>

<mosaic_0001>
module attributes {stable_mosaic.version = 11 : i64} {
  func.func @_add_kernel(%arg0: i32, %arg1: memref<8x128xf32, #tpu.memory_space<vmem>>, %arg2: memref<1x128xf32, #tpu.memory_space<vmem>>, %arg3: memref<8x128xf32, #tpu.memory_space<vmem>>) attributes {dimension_semantics = [#tpu.dimension_semantics<parallel>], iteration_bounds = array<i64: 1>, scalar_prefetch = 0 : i64, scratch_operands = 0 : i64, tpu.core_type = #tpu.core_type<tc>, window_params = [{transform_indices = @transform_0, window_bounds = array<i64: 8, 128>}, {pipeline_mode = #tpu.pipeline_mode<synchronous>, transform_indices = @transform_1, window_bounds = array<i64: 1, 128>}, {transform_indices = @transform_2, window_bounds = array<i64: 8, 128>}]} {
    %c0 = arith.constant 0 : index
    %c0_0 = arith.constant 0 : index
    %0 = vector.load %arg1[%c0, %c0_0] : memref<8x128xf32, #tpu.memory_space<vmem>>, vector<8x128xf32>
    %c0_1 = arith.constant 0 : index
    %c0_2 = arith.constant 0 : index
    %1 = vector.load %arg2[%c0_1, %c0_2] : memref<1x128xf32, #tpu.memory_space<vmem>>, vector<1x128xf32>
    %2 = vector.broadcast %1 : vector<1x128xf32> to vector<8x128xf32>
    %3 = arith.addf %0, %2 : vector<8x128xf32>
    %c0_3 = arith.constant 0 : index
    %c0_4 = arith.constant 0 : index
    %4 = vector.load %arg3[%c0_3, %c0_4] : memref<8x128xf32, #tpu.memory_space<vmem>>, vector<8x128xf32>
    tpu.vector_store %arg3[%c0_3, %c0_4], %3 {strides = array<i32>} : memref<8x128xf32, #tpu.memory_space<vmem>>, vector<8x128xf32>,
    return
  }
  func.func @transform_0(%arg0: i32) -> (i32, i32) {
    %c0_i32 = arith.constant 0 : i32
    %c0_i32_0 = arith.constant 0 : i32
    return %arg0, %c0_i32 : i32, i32
  }
  func.func @transform_1(%arg0: i32) -> (i32, i32) {
    %c0_i32 = arith.constant 0 : i32
    %c0_i32_0 = arith.constant 0 : i32
    %c0_i32_1 = arith.constant 0 : i32
    return %c0_i32, %c0_i32_0 : i32, i32
  }
  func.func @transform_2(%arg0: i32) -> (i32, i32) {
    %c0_i32 = arith.constant 0 : i32
    %c0_i32_0 = arith.constant 0 : i32
    return %arg0, %c0_i32 : i32, i32
  }
}

</mosaic_0001>

<bundles_post_ra>
// kernel: tpu_custom_call.1
= control target key start
LH: loop header
LB: loop body
LE: loop exit
PB: predicated region body
PF: predicated region fallthrough
CT: control target
= control target key end

     0   :  { %7 = vsyncpa [#allocation3], 0  ;;  %s122_s0 = inlined_call_operand.hbm [shape: f32[8,128], index: 0, kind: input, shape index: {}]   ;;  %s123_s1 = inlined_call_operand.vmem [shape: f32[1,128], index: 1, kind: input, shape index: {}]   ;;  %s124_s2 = inlined_call_operand.hbm [shape: f32[8,128], index: 2, kind: output, shape index: {}]  }
   0x1   :  { %8 = vsyncpa [#allocation4], 0  ;;  %s96_s9 = smov [#allocation2]  }
   0x2   :  { %s15_s10 = sshll.u32 %s96_s9, 4  ;;  %s16_s10 = int_to_ptr.vmem [resolvable:$true] %s15_s10 }
   0x3   :  { %s60_s11 = scalar_lea.vmem %s16_s10, 128  ;;  %p65_p1 = scmp.lt.s32.totalorder %s16_s10, %s16_s10 }
   0x4   :  { %p61_p0 = scmp.ne.s32.totalorder %s16_s10, %s60_s11  ;;  %p66_p2 = scmp.lt.s32.totalorder %s60_s11, %s60_s11 }
   0x6   :  { %p67_p3 = por %p66_p2, %p65_p1 }
   0x8   :  { %p68_p4 = pnand %p67_p3, %p61_p0 }
   0xa   :  { %71 = shalt.err (!%p68_p4)
}
   0xb   :  { %18 = dma.hbm_to_vmem [thread:$0]  %s122_s0, 128, %s16_s10, [#allocation3]  }
   0xc   :  { %92 = dma.done.wait [#allocation3], 128  }
   0xd   :  { %93 = vsyncadd [#allocation3], 4294967168  ;;  %s97_s14 = smov [#allocation5]   ;;  %v24_v0 = vld [vmem:[#allocation2] sm:$0xff] }
   0xe   :  { %s40_s15 = sshll.u32 %s97_s14, 4  ;;  %v49_v1 = vld [vmem:[%s123_s1] ss:$0 sm:$0xff]  ;;  %s41_s15 = int_to_ptr.vmem [resolvable:$true] %s40_s15 }
   0xf   :  { %v32_v2 = vadd.f32 %v49_v1, %v24_v0  ;;  %s72_s18 = scalar_lea.vmem %s41_s15, 128  ;;  %p77_p6 = scmp.lt.s32.totalorder %s41_s15, %s41_s15 }
  0x10   :  { %p73_p5 = scmp.ne.s32.totalorder %s41_s15, %s72_s18  ;;  %p78_p7 = scmp.lt.s32.totalorder %s72_s18, %s72_s18 }
  0x11   :  { %33 = vst [vmem:[#allocation5] sm:$0xff] %v32_v2 }
  0x12   :  { %p79_p8 = por %p78_p7, %p77_p6 }
  0x14   :  { %p80_p9 = pnand %p79_p8, %p73_p5 }
  0x16   :  { %83 = shalt.err (!%p80_p9)
}
  0x17   :  { %43 = dma.vmem_to_hbm [thread:$0]  %s41_s15, 128, %s124_s2, [#allocation4]  }
  0x18   :  { %94 = dma.done.wait [#allocation4], 128  }
  0x19   :  { %95 = vsyncadd [#allocation4], 4294967168 }
  0x1a   :  { %47 = vsyncpa [#allocation3], 1 }
  0x1b   :  { %48 = vsyncpa [#allocation4], 1 }

</bundles_post_ra>
